<compile_context>
chip_gen: v6e
topology: v6e:2x2x1
jax: 0.10.0
libtpu: 0.0.40
codegen_flags: <defaults>
</compile_context>

<pallas_src>
import functools

import jax
import jax.numpy as jnp
import numpy as np
from jax.experimental import pallas as pl
from jax.experimental.pallas import tpu as pltpu


def _ranker_kernel(L, P, T, W, M, x_ref, mask_ref, w01_ref, bias_ref, out_ref):
    # x_ref:    (TB, L*P, T*W)  VMEM  lane-dense activations
    # mask_ref: (TB, L*M)       VMEM  raw mask, flattened (no wrapper expansion)
    # w01_ref:  (1, T*W)        VMEM  fused rank-1 weight  w1[t]*w0[w]
    # bias_ref: (1,)            SMEM  effective bias  b0*sum(w1) + b1
    # out_ref:  (TB, M*W)       VMEM  lane-dense output
    x = x_ref[...]                                          # (TB, L*P, T*W)

    # Fused dense_0 o dense_1: one multiply pass + lane reduce over T*W.
    s1 = jnp.sum(x.astype(jnp.float32) * w01_ref[...], axis=-1) + bias_ref[0]
    # s1: (TB, L*P)

    # Max-pool over example_len T via W-wide lane windows of the ref.  Max is
    # exact in the input dtype; only the reduced (TB, L*P, W) result is carried
    # in f32, so no full-block f32 copy of x stays live across both consumers.
    mp = x_ref[:, :, 0:W]
    for t in range(1, T):
        mp = jnp.maximum(mp, x_ref[:, :, t * W:(t + 1) * W])
    mp = mp.astype(jnp.float32)                             # (TB, L*P, W)

    # Per outer-list entry l: sigmoid -> softmax over the inner-list axis P
    # (torch softmax(dim=1)), then the P-weighted sum of the max-pooled embeds.
    sem = []                                                # L x (TB, W)
    msk = []                                                # L x (TB, M)
    for l in range(L):
        e_l = jax.nn.softmax(jax.nn.sigmoid(s1[:, l * P:(l + 1) * P]), axis=-1)
        sem.append(jnp.sum(mp[:, l * P:(l + 1) * P, :] * e_l[:, :, None], axis=1))
        msk.append(mask_ref[:, l * M:(l + 1) * M].astype(jnp.float32))

    # Mask contraction over L as VPU broadcast-FMAs (no MXU, no pre-expanded
    # mask, no (TB, L, M*W) temp).  Written lane-dense, one W-wide window per
    # mask position m.
    for m in range(M):
        acc = msk[0][:, m:m + 1] * sem[0]
        for l in range(1, L):
            acc = acc + msk[l][:, m:m + 1] * sem[l]
        out_ref[:, m * W:(m + 1) * W] = acc.astype(out_ref.dtype)


def _choose_block_b(B, L, P, T, W, M, x_itemsize, budget_bytes=12 << 20):
    """Largest batch block keeping double-buffered operands + in-kernel f32
    temporaries within a scoped-VMEM budget that is safe on every generation
    (v5e default scoped VMEM is 16 MiB; v7x physical is 64 MiB).  Returns
    either B (whole batch, no ragged tail) or a multiple of 8 (keeps the
    lane-dense (block_b, M*W) output block layout-legal)."""
    per_b = (2 * L * P * T * W * x_itemsize      # x block, double-buffered
             + 2 * L * P * T * W * 4             # in-kernel f32 product / max temps
             + 2 * L * M * 4                     # mask block, double-buffered
             + 3 * M * W * 4)                    # out block (x2) + f32 accumulators
    cap = max(8, min(512, budget_bytes // max(per_b, 1)))
    if B <= cap:
        return B
    return cap - cap % 8


def passage_ranker_adj(x, mask, w0, b0, w1, b1, *, block_b=None):
    """x: (B, L, P, T, W); mask: (B, L, M).
    w0/b0: dense_0 weight (1, W) or (W,) and bias; w1/b1: dense_1 weight
    (1, T) or (T,) and bias.  Returns (B, M, W) float32."""
    B, L, P, T, W = x.shape
    M = mask.shape[-1]

    # --- Fuse dense_0 (width->1) and dense_1 (example_len->1) --------------
    #   s1 = sum_{t,w} x[t,w]*w1[t]*w0[w] + (b0*sum_t w1[t] + b1)
    w0v = jnp.asarray(w0, jnp.float32).reshape(W)
    w1v = jnp.asarray(w1, jnp.float32).reshape(T)
    b0s = jnp.asarray(b0, jnp.float32).reshape(())
    b1s = jnp.asarray(b1, jnp.float32).reshape(())
    w01 = jnp.outer(w1v, w0v).reshape(1, T * W)          # lane-dense rank-1 weight
    bias_eff = (b0s * jnp.sum(w1v) + b1s).reshape(1)     # (1,) -> SMEM

    # --- Lane-dense packing (free reshapes: contiguous dim groups only) ----
    x_ld = jnp.reshape(x, (B, L * P, T * W))
    mask_ld = jnp.reshape(mask.astype(jnp.float32), (B, L * M))

    if block_b is None:
        block_b = _choose_block_b(B, L, P, T, W, M, x.dtype.itemsize)

    kernel = functools.partial(_ranker_kernel, L, P, T, W, M)
    out_flat = pl.pallas_call(
        kernel,
        out_shape=jax.ShapeDtypeStruct((B, M * W), jnp.float32),
        grid_spec=pltpu.PrefetchScalarGridSpec(
            num_scalar_prefetch=0,
            grid=(pl.cdiv(B, block_b),),
            in_specs=[
                pl.BlockSpec((block_b, L * P, T * W), lambda i: (i, 0, 0)),
                pl.BlockSpec((block_b, L * M), lambda i: (i, 0)),
                pl.BlockSpec((1, T * W), lambda i: (0, 0)),
                pl.BlockSpec(memory_space=pltpu.MemorySpace.SMEM),
            ],
            out_specs=pl.BlockSpec((block_b, M * W), lambda i: (i, 0)),
        ),
        compiler_params=pltpu.CompilerParams(
            dimension_semantics=("parallel",)),
    )(x_ld, mask_ld, w01, bias_eff)

    # Unflatten the lane-dense output back to (B, M, W).
    return out_flat.reshape(B, M, W)


def reference(x, mask, w0, b0, w1, b1):
    """Pure-JAX reference of the PyTorch forward (unfused, for validation)."""
    s0 = jnp.einsum('blptw,w->blpt', x, w0) + b0
    s1 = jnp.einsum('blpt,t->blp', s0, w1) + b1
    e = jax.nn.softmax(jax.nn.sigmoid(s1), axis=-1)    # softmax over P
    mp = jnp.max(x, axis=3)                            # (B, L, P, W)
    s_blw = jnp.sum(mp * e[..., None], axis=2)         # (B, L, W)
    return jnp.einsum('blm,blw->bmw', mask, s_blw)     # (B, M, W)


if __name__ == "__main__":
    # Small shapes consistent with the module:
    #   example_len = T = 8, width = W = 32, batch = 2,
    #   L = len(embeds_list) = 2, P = len(inner list) = 3, mask len M = 8.
    B, L, P, T, W, M = 2, 2, 3, 8, 32, 8

    key = jax.random.PRNGKey(0)
    k1, k2, k3, k4, k5, k6 = jax.random.split(key, 6)
    x = jax.random.normal(k1, (B, L, P, T, W), dtype=jnp.float32)
    mask = (jax.random.uniform(k2, (B, L, M)) > 0.5).astype(jnp.float32)

    # PyTorch parameter shapes: dense_0.weight (1, W), dense_0.bias (1,),
    # dense_1.weight (1, T), dense_1.bias (1,).
    w0 = jax.random.normal(k3, (1, W), jnp.float32) * 0.1
    b0 = jax.random.normal(k4, (1,), jnp.float32) * 0.1
    w1 = jax.random.normal(k5, (1, T), jnp.float32) * 0.1
    b1 = jax.random.normal(k6, (1,), jnp.float32) * 0.1

    out = passage_ranker_adj(x, mask, w0, b0, w1, b1)
    out = jax.block_until_ready(out)

    ref = reference(x, mask, w0[0], b0[0], w1[0], b1[0])
    np.testing.assert_allclose(np.asarray(out), np.asarray(ref),
                               rtol=1e-5, atol=1e-5)
    print("KERNEL_OK")
</pallas_src>

<mosaic_0001>
module attributes {stable_mosaic.version = 11 : i64} {
  func.func @_ranker_kernel(%arg0: i32, %arg1: memref<2x6x256xf32, #tpu.memory_space<vmem>>, %arg2: memref<2x16xf32, #tpu.memory_space<vmem>>, %arg3: memref<1x256xf32, #tpu.memory_space<vmem>>, %arg4: memref<1xf32, #tpu.memory_space<smem>>, %arg5: memref<2x256xf32, #tpu.memory_space<vmem>>) attributes {dimension_semantics = [#tpu.dimension_semantics<parallel>], iteration_bounds = array<i64: 1>, scalar_prefetch = 0 : i64, scratch_operands = 0 : i64, tpu.core_type = #tpu.core_type<tc>, window_params = [{transform_indices = @transform_0, window_bounds = array<i64: 2, 6, 256>}, {transform_indices = @transform_1, window_bounds = array<i64: 2, 16>}, {pipeline_mode = #tpu.pipeline_mode<synchronous>, transform_indices = @transform_2, window_bounds = array<i64: 1, 256>}, {transform_indices = @transform_3, window_bounds = array<i64: 1>}, {transform_indices = @transform_4, window_bounds = array<i64: 2, 256>}]} {
    %c0 = arith.constant 0 : index
    %c0_0 = arith.constant 0 : index
    %c0_1 = arith.constant 0 : index
    %0 = vector.load %arg1[%c0, %c0_0, %c0_1] : memref<2x6x256xf32, #tpu.memory_space<vmem>>, vector<2x6x256xf32>
    %c0_2 = arith.constant 0 : index
    %c0_3 = arith.constant 0 : index
    %1 = vector.load %arg3[%c0_2, %c0_3] : memref<1x256xf32, #tpu.memory_space<vmem>>, vector<1x256xf32>
    %2 = vector.shape_cast %1 : vector<1x256xf32> to vector<1x1x256xf32>
    %3 = vector.broadcast %2 : vector<1x1x256xf32> to vector<2x6x256xf32>
    %4 = arith.mulf %0, %3 : vector<2x6x256xf32>
    %cst = arith.constant dense<0.000000e+00> : vector<2x6xf32>
    %5 = vector.multi_reduction <add>, %4, %cst [2] : vector<2x6x256xf32> to vector<2x6xf32>
    %c0_4 = arith.constant 0 : index
    %6 = memref.load %arg4[%c0_4] : memref<1xf32, #tpu.memory_space<smem>>
    %7 = vector.broadcast %6 : f32 to vector<2x6xf32>
    %8 = arith.addf %5, %7 : vector<2x6xf32>
    %c0_5 = arith.constant 0 : index
    %c0_6 = arith.constant 0 : index
    %c0_7 = arith.constant 0 : index
    %9 = vector.load %arg1[%c0_5, %c0_6, %c0_7] : memref<2x6x256xf32, #tpu.memory_space<vmem>>, vector<2x6x32xf32>
    %c0_8 = arith.constant 0 : index
    %c0_9 = arith.constant 0 : index
    %c32 = arith.constant 32 : index
    %10 = vector.load %arg1[%c0_8, %c0_9, %c32] : memref<2x6x256xf32, #tpu.memory_space<vmem>>, vector<2x6x32xf32>
    %11 = arith.maximumf %9, %10 : vector<2x6x32xf32>
    %c0_10 = arith.constant 0 : index
    %c0_11 = arith.constant 0 : index
    %c64 = arith.constant 64 : index
    %12 = vector.load %arg1[%c0_10, %c0_11, %c64] : memref<2x6x256xf32, #tpu.memory_space<vmem>>, vector<2x6x32xf32>
    %13 = arith.maximumf %11, %12 : vector<2x6x32xf32>
    %c0_12 = arith.constant 0 : index
    %c0_13 = arith.constant 0 : index
    %c96 = arith.constant 96 : index
    %14 = vector.load %arg1[%c0_12, %c0_13, %c96] : memref<2x6x256xf32, #tpu.memory_space<vmem>>, vector<2x6x32xf32>
    %15 = arith.maximumf %13, %14 : vector<2x6x32xf32>
    %c0_14 = arith.constant 0 : index
    %c0_15 = arith.constant 0 : index
    %c128 = arith.constant 128 : index
    %16 = vector.load %arg1[%c0_14, %c0_15, %c128] : memref<2x6x256xf32, #tpu.memory_space<vmem>>, vector<2x6x32xf32>
    %17 = arith.maximumf %15, %16 : vector<2x6x32xf32>
    %c0_16 = arith.constant 0 : index
    %c0_17 = arith.constant 0 : index
    %c160 = arith.constant 160 : index
    %18 = vector.load %arg1[%c0_16, %c0_17, %c160] : memref<2x6x256xf32, #tpu.memory_space<vmem>>, vector<2x6x32xf32>
    %19 = arith.maximumf %17, %18 : vector<2x6x32xf32>
    %c0_18 = arith.constant 0 : index
    %c0_19 = arith.constant 0 : index
    %c192 = arith.constant 192 : index
    %20 = vector.load %arg1[%c0_18, %c0_19, %c192] : memref<2x6x256xf32, #tpu.memory_space<vmem>>, vector<2x6x32xf32>
    %21 = arith.maximumf %19, %20 : vector<2x6x32xf32>
    %c0_20 = arith.constant 0 : index
    %c0_21 = arith.constant 0 : index
    %c224 = arith.constant 224 : index
    %22 = vector.load %arg1[%c0_20, %c0_21, %c224] : memref<2x6x256xf32, #tpu.memory_space<vmem>>, vector<2x6x32xf32>
    %23 = arith.maximumf %21, %22 : vector<2x6x32xf32>
    %24 = vector.extract_strided_slice %8 {offsets = [0, 0], sizes = [2, 3], strides = [1, 1]} : vector<2x6xf32> to vector<2x3xf32>
    %25 = arith.negf %24 : vector<2x3xf32>
    %26 = math.exp %25 : vector<2x3xf32>
    %cst_22 = arith.constant 1.000000e+00 : f32
    %27 = vector.broadcast %cst_22 : f32 to vector<2x3xf32>
    %28 = arith.addf %27, %26 : vector<2x3xf32>
    %29 = arith.divf %27, %28 : vector<2x3xf32>
    %cst_23 = arith.constant dense<0xFF800000> : vector<2xf32>
    %30 = vector.multi_reduction <maximumf>, %29, %cst_23 [1] : vector<2x3xf32> to vector<2xf32>
    %cst_24 = arith.constant 0xFF800000 : f32
    %31 = vector.broadcast %cst_24 : f32 to vector<2xf32>
    %32 = arith.maximumf %31, %30 : vector<2xf32>
    %33 = vector.shape_cast %32 : vector<2xf32> to vector<2x1xf32>
    %34 = vector.broadcast %33 : vector<2x1xf32> to vector<2x3xf32>
    %35 = arith.subf %29, %34 : vector<2x3xf32>
    %36 = math.exp %35 : vector<2x3xf32>
    %cst_25 = arith.constant dense<0.000000e+00> : vector<2xf32>
    %37 = vector.multi_reduction <add>, %36, %cst_25 [1] : vector<2x3xf32> to vector<2xf32>
    %38 = vector.shape_cast %37 : vector<2xf32> to vector<2x1xf32>
    %39 = vector.broadcast %38 : vector<2x1xf32> to vector<2x3xf32>
    %40 = arith.divf %36, %39 : vector<2x3xf32>
    %41 = vector.extract_strided_slice %23 {offsets = [0, 0, 0], sizes = [2, 3, 32], strides = [1, 1, 1]} : vector<2x6x32xf32> to vector<2x3x32xf32>
    %42 = vector.shape_cast %40 : vector<2x3xf32> to vector<2x3x1xf32>
    %43 = vector.broadcast %42 : vector<2x3x1xf32> to vector<2x3x32xf32>
    %44 = arith.mulf %41, %43 : vector<2x3x32xf32>
    %cst_26 = arith.constant dense<0.000000e+00> : vector<2x32xf32>
    %45 = vector.multi_reduction <add>, %44, %cst_26 [1] : vector<2x3x32xf32> to vector<2x32xf32>
    %c0_27 = arith.constant 0 : index
    %c0_28 = arith.constant 0 : index
    %46 = vector.load %arg2[%c0_27, %c0_28] : memref<2x16xf32, #tpu.memory_space<vmem>>, vector<2x8xf32>
    %47 = vector.extract_strided_slice %8 {offsets = [0, 3], sizes = [2, 3], strides = [1, 1]} : vector<2x6xf32> to vector<2x3xf32>
    %48 = arith.negf %47 : vector<2x3xf32>
    %49 = math.exp %48 : vector<2x3xf32>
    %cst_29 = arith.constant 1.000000e+00 : f32
    %50 = vector.broadcast %cst_29 : f32 to vector<2x3xf32>
    %51 = arith.addf %50, %49 : vector<2x3xf32>
    %52 = arith.divf %50, %51 : vector<2x3xf32>
    %cst_30 = arith.constant dense<0xFF800000> : vector<2xf32>
    %53 = vector.multi_reduction <maximumf>, %52, %cst_30 [1] : vector<2x3xf32> to vector<2xf32>
    %cst_31 = arith.constant 0xFF800000 : f32
    %54 = vector.broadcast %cst_31 : f32 to vector<2xf32>
    %55 = arith.maximumf %54, %53 : vector<2xf32>
    %56 = vector.shape_cast %55 : vector<2xf32> to vector<2x1xf32>
    %57 = vector.broadcast %56 : vector<2x1xf32> to vector<2x3xf32>
    %58 = arith.subf %52, %57 : vector<2x3xf32>
    %59 = math.exp %58 : vector<2x3xf32>
    %cst_32 = arith.constant dense<0.000000e+00> : vector<2xf32>
    %60 = vector.multi_reduction <add>, %59, %cst_32 [1] : vector<2x3xf32> to vector<2xf32>
    %61 = vector.shape_cast %60 : vector<2xf32> to vector<2x1xf32>
    %62 = vector.broadcast %61 : vector<2x1xf32> to vector<2x3xf32>
    %63 = arith.divf %59, %62 : vector<2x3xf32>
    %64 = vector.extract_strided_slice %23 {offsets = [0, 3, 0], sizes = [2, 3, 32], strides = [1, 1, 1]} : vector<2x6x32xf32> to vector<2x3x32xf32>
    %65 = vector.shape_cast %63 : vector<2x3xf32> to vector<2x3x1xf32>
    %66 = vector.broadcast %65 : vector<2x3x1xf32> to vector<2x3x32xf32>
    %67 = arith.mulf %64, %66 : vector<2x3x32xf32>
    %cst_33 = arith.constant dense<0.000000e+00> : vector<2x32xf32>
    %68 = vector.multi_reduction <add>, %67, %cst_33 [1] : vector<2x3x32xf32> to vector<2x32xf32>
    %c0_34 = arith.constant 0 : index
    %c8 = arith.constant 8 : index
    %69 = vector.load %arg2[%c0_34, %c8] : memref<2x16xf32, #tpu.memory_space<vmem>>, vector<2x8xf32>
    %70 = vector.extract_strided_slice %46 {offsets = [0, 0], sizes = [2, 1], strides = [1, 1]} : vector<2x8xf32> to vector<2x1xf32>
    %71 = vector.broadcast %70 : vector<2x1xf32> to vector<2x32xf32>
    %72 = arith.mulf %71, %45 : vector<2x32xf32>
    %73 = vector.extract_strided_slice %69 {offsets = [0, 0], sizes = [2, 1], strides = [1, 1]} : vector<2x8xf32> to vector<2x1xf32>
    %74 = vector.broadcast %73 : vector<2x1xf32> to vector<2x32xf32>
    %75 = arith.mulf %74, %68 : vector<2x32xf32>
    %76 = arith.addf %72, %75 : vector<2x32xf32>
    %c0_35 = arith.constant 0 : index
    %c0_36 = arith.constant 0 : index
    %77 = vector.load %arg5[%c0_35, %c0_36] : memref<2x256xf32, #tpu.memory_space<vmem>>, vector<2x32xf32>
    tpu.vector_store %arg5[%c0_35, %c0_36], %76 {strides = array<i32>} : memref<2x256xf32, #tpu.memory_space<vmem>>, vector<2x32xf32>,
    %78 = vector.extract_strided_slice %46 {offsets = [0, 1], sizes = [2, 1], strides = [1, 1]} : vector<2x8xf32> to vector<2x1xf32>
    %79 = vector.broadcast %78 : vector<2x1xf32> to vector<2x32xf32>
    %80 = arith.mulf %79, %45 : vector<2x32xf32>
    %81 = vector.extract_strided_slice %69 {offsets = [0, 1], sizes = [2, 1], strides = [1, 1]} : vector<2x8xf32> to vector<2x1xf32>
    %82 = vector.broadcast %81 : vector<2x1xf32> to vector<2x32xf32>
    %83 = arith.mulf %82, %68 : vector<2x32xf32>
    %84 = arith.addf %80, %83 : vector<2x32xf32>
    %c0_37 = arith.constant 0 : index
    %c32_38 = arith.constant 32 : index
    %85 = vector.load %arg5[%c0_37, %c32_38] : memref<2x256xf32, #tpu.memory_space<vmem>>, vector<2x32xf32>
    tpu.vector_store %arg5[%c0_37, %c32_38], %84 {strides = array<i32>} : memref<2x256xf32, #tpu.memory_space<vmem>>, vector<2x32xf32>,
    %86 = vector.extract_strided_slice %46 {offsets = [0, 2], sizes = [2, 1], strides = [1, 1]} : vector<2x8xf32> to vector<2x1xf32>
    %87 = vector.broadcast %86 : vector<2x1xf32> to vector<2x32xf32>
    %88 = arith.mulf %87, %45 : vector<2x32xf32>
    %89 = vector.extract_strided_slice %69 {offsets = [0, 2], sizes = [2, 1], strides = [1, 1]} : vector<2x8xf32> to vector<2x1xf32>
    %90 = vector.broadcast %89 : vector<2x1xf32> to vector<2x32xf32>
    %91 = arith.mulf %90, %68 : vector<2x32xf32>
    %92 = arith.addf %88, %91 : vector<2x32xf32>
    %c0_39 = arith.constant 0 : index
    %c64_40 = arith.constant 64 : index
    %93 = vector.load %arg5[%c0_39, %c64_40] : memref<2x256xf32, #tpu.memory_space<vmem>>, vector<2x32xf32>
    tpu.vector_store %arg5[%c0_39, %c64_40], %92 {strides = array<i32>} : memref<2x256xf32, #tpu.memory_space<vmem>>, vector<2x32xf32>,
    %94 = vector.extract_strided_slice %46 {offsets = [0, 3], sizes = [2, 1], strides = [1, 1]} : vector<2x8xf32> to vector<2x1xf32>
    %95 = vector.broadcast %94 : vector<2x1xf32> to vector<2x32xf32>
    %96 = arith.mulf %95, %45 : vector<2x32xf32>
    %97 = vector.extract_strided_slice %69 {offsets = [0, 3], sizes = [2, 1], strides = [1, 1]} : vector<2x8xf32> to vector<2x1xf32>
    %98 = vector.broadcast %97 : vector<2x1xf32> to vector<2x32xf32>
    %99 = arith.mulf %98, %68 : vector<2x32xf32>
    %100 = arith.addf %96, %99 : vector<2x32xf32>
    %c0_41 = arith.constant 0 : index
    %c96_42 = arith.constant 96 : index
    %101 = vector.load %arg5[%c0_41, %c96_42] : memref<2x256xf32, #tpu.memory_space<vmem>>, vector<2x32xf32>
    tpu.vector_store %arg5[%c0_41, %c96_42], %100 {strides = array<i32>} : memref<2x256xf32, #tpu.memory_space<vmem>>, vector<2x32xf32>,
    %102 = vector.extract_strided_slice %46 {offsets = [0, 4], sizes = [2, 1], strides = [1, 1]} : vector<2x8xf32> to vector<2x1xf32>
    %103 = vector.broadcast %102 : vector<2x1xf32> to vector<2x32xf32>
    %104 = arith.mulf %103, %45 : vector<2x32xf32>
    %105 = vector.extract_strided_slice %69 {offsets = [0, 4], sizes = [2, 1], strides = [1, 1]} : vector<2x8xf32> to vector<2x1xf32>
    %106 = vector.broadcast %105 : vector<2x1xf32> to vector<2x32xf32>
    %107 = arith.mulf %106, %68 : vector<2x32xf32>
    %108 = arith.addf %104, %107 : vector<2x32xf32>
    %c0_43 = arith.constant 0 : index
    %c128_44 = arith.constant 128 : index
    %109 = vector.load %arg5[%c0_43, %c128_44] : memref<2x256xf32, #tpu.memory_space<vmem>>, vector<2x32xf32>
    tpu.vector_store %arg5[%c0_43, %c128_44], %108 {strides = array<i32>} : memref<2x256xf32, #tpu.memory_space<vmem>>, vector<2x32xf32>,
    %110 = vector.extract_strided_slice %46 {offsets = [0, 5], sizes = [2, 1], strides = [1, 1]} : vector<2x8xf32> to vector<2x1xf32>
    %111 = vector.broadcast %110 : vector<2x1xf32> to vector<2x32xf32>
    %112 = arith.mulf %111, %45 : vector<2x32xf32>
    %113 = vector.extract_strided_slice %69 {offsets = [0, 5], sizes = [2, 1], strides = [1, 1]} : vector<2x8xf32> to vector<2x1xf32>
    %114 = vector.broadcast %113 : vector<2x1xf32> to vector<2x32xf32>
    %115 = arith.mulf %114, %68 : vector<2x32xf32>
    %116 = arith.addf %112, %115 : vector<2x32xf32>
    %c0_45 = arith.constant 0 : index
    %c160_46 = arith.constant 160 : index
    %117 = vector.load %arg5[%c0_45, %c160_46] : memref<2x256xf32, #tpu.memory_space<vmem>>, vector<2x32xf32>
    tpu.vector_store %arg5[%c0_45, %c160_46], %116 {strides = array<i32>} : memref<2x256xf32, #tpu.memory_space<vmem>>, vector<2x32xf32>,
    %118 = vector.extract_strided_slice %46 {offsets = [0, 6], sizes = [2, 1], strides = [1, 1]} : vector<2x8xf32> to vector<2x1xf32>
    %119 = vector.broadcast %118 : vector<2x1xf32> to vector<2x32xf32>
    %120 = arith.mulf %119, %45 : vector<2x32xf32>
    %121 = vector.extract_strided_slice %69 {offsets = [0, 6], sizes = [2, 1], strides = [1, 1]} : vector<2x8xf32> to vector<2x1xf32>
    %122 = vector.broadcast %121 : vector<2x1xf32> to vector<2x32xf32>
    %123 = arith.mulf %122, %68 : vector<2x32xf32>
    %124 = arith.addf %120, %123 : vector<2x32xf32>
    %c0_47 = arith.constant 0 : index
    %c192_48 = arith.constant 192 : index
    %125 = vector.load %arg5[%c0_47, %c192_48] : memref<2x256xf32, #tpu.memory_space<vmem>>, vector<2x32xf32>
    tpu.vector_store %arg5[%c0_47, %c192_48], %124 {strides = array<i32>} : memref<2x256xf32, #tpu.memory_space<vmem>>, vector<2x32xf32>,
    %126 = vector.extract_strided_slice %46 {offsets = [0, 7], sizes = [2, 1], strides = [1, 1]} : vector<2x8xf32> to vector<2x1xf32>
    %127 = vector.broadcast %126 : vector<2x1xf32> to vector<2x32xf32>
    %128 = arith.mulf %127, %45 : vector<2x32xf32>
    %129 = vector.extract_strided_slice %69 {offsets = [0, 7], sizes = [2, 1], strides = [1, 1]} : vector<2x8xf32> to vector<2x1xf32>
    %130 = vector.broadcast %129 : vector<2x1xf32> to vector<2x32xf32>
    %131 = arith.mulf %130, %68 : vector<2x32xf32>
    %132 = arith.addf %128, %131 : vector<2x32xf32>
    %c0_49 = arith.constant 0 : index
    %c224_50 = arith.constant 224 : index
    %133 = vector.load %arg5[%c0_49, %c224_50] : memref<2x256xf32, #tpu.memory_space<vmem>>, vector<2x32xf32>
    tpu.vector_store %arg5[%c0_49, %c224_50], %132 {strides = array<i32>} : memref<2x256xf32, #tpu.memory_space<vmem>>, vector<2x32xf32>,
    return
  }
  func.func @transform_0(%arg0: i32) -> (i32, i32, i32) {
    %c0_i32 = arith.constant 0 : i32
    %c0_i32_0 = arith.constant 0 : i32
    %c0_i32_1 = arith.constant 0 : i32
    return %arg0, %c0_i32, %c0_i32_0 : i32, i32, i32
  }
  func.func @transform_1(%arg0: i32) -> (i32, i32) {
    %c0_i32 = arith.constant 0 : i32
    %c0_i32_0 = arith.constant 0 : i32
    return %arg0, %c0_i32 : i32, i32
  }
  func.func @transform_2(%arg0: i32) -> (i32, i32) {
    %c0_i32 = arith.constant 0 : i32
    %c0_i32_0 = arith.constant 0 : i32
    %c0_i32_1 = arith.constant 0 : i32
    return %c0_i32, %c0_i32_0 : i32, i32
  }
  func.func @transform_3(%arg0: i32) -> i32 {
    %c0_i32 = arith.constant 0 : i32
    %c0_i32_0 = arith.constant 0 : i32
    return %c0_i32 : i32
  }
  func.func @transform_4(%arg0: i32) -> (i32, i32) {
    %c0_i32 = arith.constant 0 : i32
    %c0_i32_0 = arith.constant 0 : i32
    return %arg0, %c0_i32 : i32, i32
  }
}

</mosaic_0001>

<bundles_post_ra>
// kernel: tpu_custom_call.1
= control target key start
LH: loop header
LB: loop body
LE: loop exit
PB: predicated region body
PF: predicated region fallthrough
CT: control target
= control target key end

     0   :  { %v25_v0 = vlaneseq  ;;  %s805_s0 = inlined_call_operand.vmem [shape: f32[2,6,256], index: 0, kind: input, shape index: {}]   ;;  %s806_s1 = inlined_call_operand.vmem [shape: f32[2,16], index: 1, kind: input, shape index: {}]   ;;  %s807_s2 = inlined_call_operand.vmem [shape: f32[1,256], index: 2, kind: input, shape index: {}]   ;;  %s808_s3 = inlined_call_operand.<no memory space> [shape: f32[1], index: 3, kind: input, shape index: {}]   ;;  %s809_s4 = inlined_call_operand.hbm [shape: f32[2,256], index: 4, kind: output, shape index: {}]  }
   0x2   :  { %v636_v1 = vshrl.u32 %v25_v0, 7 }
   0x3   :  { %10 = vsyncpa [#allocation4], 0  ;;  %v23_v2 = vld [vmem:[%s807_s2] sm:$0x3]  ;;  %v653_v6 = vld [vmem:[%s805_s0 + $0x8] sm:$0x3f]  ;;  %v51_v21 = vstv %s808_s3 }
   0x4   :  { %v19_v3 = vld [vmem:[%s805_s0] sm:$0x3f]  ;;  %v645_v4 = vsub.s32 0, %v636_v1  ;;  %v648_v5 = vsub.s32 1, %v636_v1  ;;  %v21_v7 = vld [vmem:[%s805_s0 + $0x10] sm:$0x3f] }
   0x5   :  { %v661_v8 = vld [vmem:[%s805_s0 + $0x18] sm:$0x3f]  ;;  %vm39_vm0 = vcmask 1045504   ;;  %v125_v32 = vand.u32 127, %v25_v0  ;;  %vm134_vm1 = vcmask 1041409   ;;  %vm222_vm2 = vcmask 42008  }
   0x6   :  { %v28_v9 = vrot.slane %v23_v2, %v645_v4  ;;  %v32_v10 = vrot.slane %v23_v2, %v648_v5  ;;  %vm137_vm3 = vcmask 17408   ;;  %v590_v41 = vmov 0   ;;  %v694_v60 = vld [vmem:[%s805_s0] sm:$0x3f]  ;;  %s591_s27 = smov 96   ;;  %s593_s30 = smov 32  }
   0x7   :  { %v128_v33 = vsub.s32 %v125_v32, %v636_v1  ;;  %525 = vset.pattern.permute.xlu1 %v590_v41  ;;  %524 = vset.pattern.permute.xlu0 %v590_v41  ;;  %v701_v61 = vld [vmem:[%s805_s0 + $0x10] sm:$0x3f]  ;;  %v251_v62 = vadd.s32 3, %v125_v32  ;;  %s592_s0 = smov 64   ;;  %vm206_vm4 = vcmask 256000   ;;  %vm332_vm5 = vcmask 254976  }
   0x8   :  { %v35_v11 = vmul.f32 %v28_v9, %v19_v3  ;;  %v36_v12 = vmul.f32 %v32_v10, %v653_v6  ;;  %v37_v13 = vmul.f32 %v28_v9, %v21_v7  ;;  %v38_v14 = vmul.f32 %v32_v10, %v661_v8 }
   0x9   :  { %v254_v63 = vsub.s32 %v251_v62, %v636_v1  ;;  %vm356_vm6 = vcmask 517376   ;;  %vm380_vm7 = vcmask 779776   ;;  %vm404_vm8 = vcmask 1042176  }
   0xa   :  { %v40_v15 = vsel %vm39_vm0, %v35_v11, 0.0  ;;  %v41_v16 = vsel %vm39_vm0, %v36_v12, 0.0  ;;  %v45_v17 = vsel %vm39_vm0, %v37_v13, 0.0  ;;  %v46_v18 = vsel %vm39_vm0, %v38_v14, 0.0 }
   0xb   :  { %v42_v19 = vadd.f32 %v41_v16, %v40_v15  ;;  %v47_v20 = vadd.f32 %v46_v18, %v45_v17  ;;  %v594_v17 = vmov 8   ;;  %v729_v18 = vld [vmem:[%s806_s1] sm:$0x3]  ;;  %s610_s1 = smov [#allocation3]  }
   0xc   :  { %s493_s7 = sshll.u32 %s610_s1, 4  ;;  %s494_s7 = int_to_ptr.vmem [resolvable:$true] %s493_s7 }
   0xd   :  { %43 = vadd.xlane.f32.xlu0 %v42_v19  ;;  %v595_v19 = vmov 1   ;;  %s568_s8 = scalar_lea.vmem %s494_s7, 64  ;;  %p573_p1 = scmp.lt.s32.totalorder %s494_s7, %s494_s7 }
   0xe   :  { %p569_p0 = scmp.ne.s32.totalorder %s494_s7, %s568_s8  ;;  %p574_p2 = scmp.lt.s32.totalorder %s568_s8, %s568_s8 }
  0x10   :  { %p575_p3 = por %p574_p2, %p573_p1 }
  0x11   :  { %48 = vadd.xlane.f32.xlu0 %v47_v20  ;;  %v596_v20 = vmov 9  }
  0x12   :  { %p576_p4 = pnand %p575_p3, %p569_p0 }
  0x96   :  { %v44_v22 = vpop.xlane.xlu0 %43 }
  0x97   :  { %v52_v23 = vadd.f32 %v51_v21, %v44_v22  ;;  %v598_v22 = vmov 2  }
  0x99   :  { %v501_v24 = vmul.f32 -1.442695, %v52_v23  ;;  %v599_v23 = vmov 3  }
  0x9a   :  { %v49_v25 = vpop.xlane.xlu0 %48 }
  0x9b   :  { %544 = vpow2.f32 %v501_v24  ;;  %v53_v26 = vadd.f32 %v51_v21, %v49_v25  ;;  %v597_v21 = vmov 10  }
  0x9d   :  { %v502_v27 = vmul.f32 -1.442695, %v53_v26 }
  0x9f   :  { %546 = vpow2.f32 %v502_v27 }
  0xa8   :  { %v545_v28 = vpop.eup %544 }
  0xa9   :  { %v116_v29 = vadd.f32 1.0, %v545_v28 }
  0xab   :  { %548 = vrcp.f32 %v116_v29 }
  0xac   :  { %v547_v30 = vpop.eup %546 }
  0xad   :  { %v117_v31 = vadd.f32 1.0, %v547_v30 }
  0xaf   :  { %550 = vrcp.f32 %v117_v31 }
  0xb8   :  { %v549_v34 = vpop.eup %548 }
  0xb9   :  { %v129_v36 = vrot.slane %v549_v34, %v128_v33 }
  0xbc   :  { %v551_v35 = vpop.eup %550 }
  0xbd   :  { %v133_v37 = vrot.slane %v551_v35, %v128_v33 }
  0xbf   :  { %v135_v38 = vsel %vm134_vm1, %v133_v37, %v129_v36 }
  0xc0   :  { %v223_v39 = vsel %vm222_vm2, %v135_v38, -inf  ;;  %v138_v40 = vsel %vm137_vm3, %v135_v38, -inf }
  0xc1   :  { %224 = vmax.xlane.f32.xlu1 %v223_v39  ;;  %v601_v39 = vmov 11  }
  0xc5   :  { %139 = vmax.xlane.f32.xlu1 %v138_v40  ;;  %v602_v40 = vmov 13  }
 0x14a   :  { %v225_v42 = vpop.xlane.xlu1 %224 }
 0x14b   :  { %v230_v43 = vrot.slane %v225_v42, %v645_v4  ;;  %v234_v44 = vrot.slane %v225_v42, %v648_v5  ;;  %v604_v42 = vmov 6  }
 0x14d   :  { %v237_v45 = vsub.f32 %v549_v34, %v230_v43  ;;  %v238_v46 = vsub.f32 %v551_v35, %v234_v44  ;;  %v605_v43 = vmov 14   ;;  %v606_v44 = vmov 7  }
 0x14e   :  { %v140_v47 = vpop.xlane.xlu1 %139 }
 0x14f   :  { %v239_v48 = vmul.f32 1.442695, %v237_v45  ;;  %v241_v49 = vmul.f32 1.442695, %v238_v46  ;;  %v145_v50 = vrot.slane %v140_v47, %v645_v4  ;;  %v149_v51 = vrot.slane %v140_v47, %v648_v5 }
 0x150   :  { %v607_v45 = vmov 12   ;;  %v608_v46 = vmov 15  }
 0x151   :  { %552 = vpow2.f32 %v239_v48  ;;  %v152_v52 = vsub.f32 %v549_v34, %v145_v50  ;;  %v153_v53 = vsub.f32 %v551_v35, %v149_v51 }
 0x152   :  { %554 = vpow2.f32 %v241_v49 }
 0x153   :  { %v154_v54 = vmul.f32 1.442695, %v152_v52  ;;  %v156_v55 = vmul.f32 1.442695, %v153_v53 }
 0x155   :  { %556 = vpow2.f32 %v154_v54 }
 0x156   :  { %558 = vpow2.f32 %v156_v55 }
 0x15e   :  { %v679_v56 = vpop.eup %552 }
 0x15f   :  { %v681_v57 = vpop.eup %554  ;;  %246 = vperm.xlu0 %524, %v679_v56  }
 0x160   :  { %249 = vperm.xlu1 %525, %v681_v57  }
 0x162   :  { %v685_v58 = vpop.eup %556 }
 0x163   :  { %v688_v59 = vpop.eup %558  ;;  %526 = vset.pattern.permute.xlu0 %v594_v17 }
 0x164   :  { %161 = vperm.xlu1 %525, %v685_v58  }
 0x168   :  { %164 = vperm.xlu1 %525, %v688_v59  }
 0x16c   :  { %58 = vrot.lane.b32.xlu1 %v694_v60, %s591_s27 }
 0x170   :  { %60 = vrot.lane.b32.xlu1 %v701_v61, %s591_s27 }
 0x1da   :  { %v247_v0 = vpop.permute.xlu0 %246 }
 0x1db   :  { %v255_v2 = vrot.slane %v247_v0, %v254_v63  ;;  %v250_v3 = vpop.permute.xlu1 %249 }
 0x1dc   :  { %v259_v7 = vrot.slane %v250_v3, %v254_v63 }
 0x1de   :  { %v260_v9 = vsel %vm134_vm1, %v259_v7, %v255_v2 }
 0x1df   :  { %v162_v10 = vpop.permute.xlu1 %161  ;;  %v262_v11 = vsel %vm137_vm3, %v260_v9, 0.0 }
 0x1e0   :  { %263 = vadd.xlane.f32.xlu1 %v262_v11  ;;  %v169_v13 = vrot.slane %v162_v10, %v128_v33 }
 0x1e3   :  { %v165_v12 = vpop.permute.xlu1 %164 }
 0x1e4   :  { %v173_v14 = vrot.slane %v165_v12, %v128_v33 }
 0x1e6   :  { %v174_v15 = vsel %vm134_vm1, %v173_v14, %v169_v13 }
 0x1e7   :  { %v176_v16 = vsel %vm137_vm3, %v174_v15, 0.0  ;;  %v744_v24 = vpop.permute.xlu1 %58 }
 0x1e8   :  { %177 = vadd.xlane.f32.xlu0 %v176_v16  ;;  %v64_v63 = vmax.f32 %v694_v60, %v744_v24 }
 0x1eb   :  { %v746_v25 = vpop.permute.xlu1 %60 }
 0x1f1   :  { %66 = vrot.lane.b32.xlu1 %v694_v60, %s592_s0 }
 0x1f5   :  { %74 = vrot.lane.b32.xlu1 %v694_v60, %s593_s30 }
 0x1f9   :  { %76 = vrot.lane.b32.xlu1 %v701_v61, %s593_s30 }
 0x1fd   :  { %86 = vrot.lane.b32.xlu1 %v653_v6, %s591_s27 }
 0x1fe   :  { %68 = vrot.lane.b32.xlu0 %v701_v61, %s592_s0 }
 0x201   :  { %94 = vrot.lane.b32.xlu1 %v653_v6, %s592_s0 }
 0x202   :  { %88 = vrot.lane.b32.xlu0 %v661_v8, %s591_s27 }
 0x205   :  { %102 = vrot.lane.b32.xlu1 %v653_v6, %s593_s30 }
 0x206   :  { %96 = vrot.lane.b32.xlu0 %v661_v8, %s592_s0 }
 0x209   :  { %314 = vperm.xlu1 %525, %v729_v18  }
 0x20a   :  { %104 = vrot.lane.b32.xlu0 %v661_v8, %s593_s30 }
 0x20d   :  { %527 = vset.pattern.permute.xlu1 %v595_v19 }
 0x20e   :  { %335 = vperm.xlu1 %527, %v729_v18   ;;  %323 = vperm.xlu0 %526, %v729_v18  }
 0x212   :  { %528 = vset.pattern.permute.xlu1 %v596_v20  ;;  %530 = vset.pattern.permute.xlu0 %v597_v21 }
 0x213   :  { %340 = vperm.xlu1 %528, %v729_v18   ;;  %364 = vperm.xlu0 %530, %v729_v18  }
 0x217   :  { %529 = vset.pattern.permute.xlu1 %v598_v22  ;;  %533 = vset.pattern.permute.xlu0 %v590_v41 }
 0x218   :  { %359 = vperm.xlu1 %529, %v729_v18  }
 0x21c   :  { %531 = vset.pattern.permute.xlu1 %v599_v23 }
 0x21d   :  { %383 = vperm.xlu1 %531, %v729_v18  }
 0x221   :  { %532 = vset.pattern.permute.xlu1 %v590_v41  ;;  %v603_v41 = vmov 5  }
 0x269   :  { %v264_v26 = vpop.xlane.xlu1 %263 }
 0x26a   :  { %v269_v28 = vrot.slane %v264_v26, %v645_v4  ;;  %v273_v31 = vrot.slane %v264_v26, %v648_v5 }
 0x26d   :  { %v67_v47 = vpop.permute.xlu1 %66 }
 0x26e   :  { %v72_v3 = vmax.f32 %v64_v63, %v67_v47 }
 0x271   :  { %v178_v27 = vpop.xlane.xlu0 %177  ;;  %v75_v48 = vpop.permute.xlu1 %74 }
 0x272   :  { %v183_v29 = vrot.slane %v178_v27, %v645_v4  ;;  %v187_v30 = vrot.slane %v178_v27, %v648_v5  ;;  %v600_v5 = vmov 4   ;;  %v80_v9 = vmax.f32 %v72_v3, %v75_v48 }
 0x274   :  { %560 = vrcp.f32 %v183_v29  ;;  %v82_v12 = vmax.f32 %v80_v9, %v653_v6 }
 0x275   :  { %562 = vrcp.f32 %v187_v30  ;;  %v77_v49 = vpop.permute.xlu1 %76  ;;  %v69_v53 = vpop.permute.xlu0 %68 }
 0x276   :  { %564 = vrcp.f32 %v269_v28 }
 0x277   :  { %566 = vrcp.f32 %v273_v31 }
 0x279   :  { %v87_v50 = vpop.permute.xlu1 %86  ;;  %v89_v55 = vpop.permute.xlu0 %88 }
 0x27a   :  { %v92_v14 = vmax.f32 %v82_v12, %v87_v50  ;;  %v609_v50 = vmov 1983009808  }
 0x27d   :  { %v95_v51 = vpop.permute.xlu1 %94 }
 0x27e   :  { %v100_v16 = vmax.f32 %v92_v14, %v95_v51  ;;  %v347_v51 = vunpack.c.l.s4 %v609_v50 }
 0x281   :  { %v561_v32 = vpop.eup %560  ;;  %v103_v52 = vpop.permute.xlu1 %102 }
 0x282   :  { %v563_v33 = vpop.eup %562  ;;  %v191_v34 = vmul.f32 %v561_v32, %v685_v58  ;;  %v65_v58 = vmax.f32 %v701_v61, %v746_v25  ;;  %v108_v60 = vmax.f32 %v100_v16, %v103_v52 }
 0x283   :  { %v565_v35 = vpop.eup %564  ;;  %v193_v36 = vmul.f32 %v563_v33, %v688_v59 }
 0x284   :  { %v567_v37 = vpop.eup %566  ;;  %196 = vperm.xlu1 %532, %v191_v34   ;;  %v277_v4 = vmul.f32 %v565_v35, %v679_v56  ;;  %v73_v59 = vmax.f32 %v65_v58, %v69_v53 }
 0x285   :  { %201 = vperm.xlu0 %533, %v193_v36   ;;  %v279_v38 = vmul.f32 %v567_v37, %v681_v57  ;;  %v765_v54 = vpop.permute.xlu1 %314  ;;  %v97_v57 = vpop.permute.xlu0 %96 }
 0x286   :  { %v81_v2 = vmax.f32 %v73_v59, %v77_v49 }
 0x288   :  { %282 = vperm.xlu1 %532, %v277_v4   ;;  %v83_v11 = vmax.f32 %v81_v2, %v661_v8  ;;  %v348_v2 = vunpack.c.0.s8 %v347_v51 }
 0x289   :  { %287 = vperm.xlu0 %533, %v279_v38   ;;  %v767_v56 = vpop.permute.xlu1 %335  ;;  %v105_v0 = vpop.permute.xlu0 %104 }
 0x28a   :  { %v93_v13 = vmax.f32 %v83_v11, %v89_v55 }
 0x28c   :  { %535 = vset.pattern.permute.xlu1 %v600_v5  ;;  %v101_v17 = vmax.f32 %v93_v13, %v97_v57  ;;  %v351_v13 = vsub.s32 %v348_v2, %v636_v1 }
 0x28d   :  { %534 = vset.pattern.permute.xlu0 %v601_v39  ;;  %407 = vperm.xlu1 %535, %v729_v18   ;;  %v777_v10 = vpop.permute.xlu0 %323 }
 0x28e   :  { %388 = vperm.xlu0 %534, %v729_v18   ;;  %v771_v62 = vpop.permute.xlu1 %340 }
 0x291   :  { %537 = vset.pattern.permute.xlu1 %v602_v40  ;;  %v365_v15 = vpop.permute.xlu0 %364 }
 0x292   :  { %536 = vset.pattern.permute.xlu0 %v603_v41  ;;  %424 = vperm.xlu1 %537, %v729_v18  }
 0x293   :  { %419 = vperm.xlu0 %536, %v729_v18   ;;  %v775_v7 = vpop.permute.xlu1 %359 }
 0x296   :  { %538 = vset.pattern.permute.xlu1 %v604_v42 }
 0x297   :  { %539 = vset.pattern.permute.xlu0 %v605_v43  ;;  %442 = vperm.xlu1 %538, %v729_v18  }
 0x298   :  { %447 = vperm.xlu0 %539, %v729_v18   ;;  %v781_v61 = vpop.permute.xlu1 %383 }
 0x29b   :  { %540 = vset.pattern.permute.xlu1 %v606_v44 }
 0x29c   :  { %542 = vset.pattern.permute.xlu0 %v607_v45  ;;  %465 = vperm.xlu1 %540, %v729_v18  }
 0x29d   :  { %412 = vperm.xlu0 %542, %v729_v18  }
 0x2a0   :  { %541 = vset.pattern.permute.xlu1 %v608_v46 }
 0x2a1   :  { %470 = vperm.xlu1 %541, %v729_v18   ;;  %543 = vset.pattern.permute.xlu0 %v608_v46  ;;  %v109_v18 = vmax.f32 %v101_v17, %v105_v0 }
 0x2ff   :  { %v197_v19 = vpop.permute.xlu1 %196 }
 0x300   :  { %v202_v20 = vpop.permute.xlu0 %201  ;;  %v204_v21 = vmul.f32 %v197_v19, %v108_v60 }
 0x301   :  { %v205_v22 = vmul.f32 %v202_v20, %v109_v18 }
 0x302   :  { %v207_v23 = vsel %vm206_vm4, %v204_v21, 0.0 }
 0x303   :  { %v214_v8 = vsel %vm206_vm4, %v205_v22, 0.0  ;;  %v208_v24 = vrot.slane %v207_v23, 4  ;;  %v283_v6 = vpop.permute.xlu1 %282 }
 0x304   :  { %v215_v25 = vrot.slane %v214_v8, 4  ;;  %v288_v26 = vpop.permute.xlu0 %287  ;;  %v290_v27 = vmul.f32 %v283_v6, %v108_v60 }
 0x305   :  { %v209_v28 = vadd.f32 %v208_v24, %v207_v23  ;;  %v291_v29 = vmul.f32 %v288_v26, %v109_v18 }
 0x306   :  { %v216_v30 = vadd.f32 %v215_v25, %v214_v8  ;;  %v294_v31 = vrot.slane %v290_v27, 3 }
 0x307   :  { %v210_v32 = vrot.slane %v209_v28, 2  ;;  %v295_v33 = vrot.slane %v291_v29, 3 }
 0x308   :  { %v217_v34 = vrot.slane %v216_v30, 2  ;;  %v298_v35 = vsel %vm206_vm4, %v294_v31, 0.0  ;;  %v408_v36 = vpop.permute.xlu1 %407 }
 0x309   :  { %v211_v37 = vadd.f32 %v210_v32, %v209_v28  ;;  %v305_v4 = vsel %vm206_vm4, %v295_v33, 0.0  ;;  %v299_v38 = vrot.slane %v298_v35, 4  ;;  %v389_v5 = vpop.permute.xlu0 %388 }
 0x30a   :  { %v218_v39 = vadd.f32 %v217_v34, %v216_v30  ;;  %v306_v40 = vrot.slane %v305_v4, 4 }
 0x30b   :  { %v300_v41 = vadd.f32 %v299_v38, %v298_v35  ;;  %v212_v43 = vrot.slane %v211_v37, 1 }
 0x30c   :  { %v219_v42 = vrot.slane %v218_v39, 1  ;;  %v307_v44 = vadd.f32 %v306_v40, %v305_v4 }
 0x30d   :  { %v301_v45 = vrot.slane %v300_v41, 2  ;;  %v425_v46 = vpop.permute.xlu1 %424  ;;  %v213_v53 = vadd.f32 %v212_v43, %v211_v37 }
 0x30e   :  { %v308_v47 = vrot.slane %v307_v44, 2  ;;  %v420_v48 = vpop.permute.xlu0 %419  ;;  %v220_v52 = vadd.f32 %v219_v42, %v218_v39 }
 0x30f   :  { %v302_v49 = vadd.f32 %v301_v45, %v300_v41 }
 0x310   :  { %v309_v55 = vadd.f32 %v308_v47, %v307_v44  ;;  %v319_v3 = vsel %vm134_vm1, %v220_v52, %v213_v53 }
 0x311   :  { %v303_v57 = vrot.slane %v302_v49, 1  ;;  %v362_v14 = vmul.f32 %v775_v7, %v319_v3  ;;  %v338_v17 = vmul.f32 %v767_v56, %v319_v3  ;;  %v321_v20 = vmul.f32 %v319_v3, %v765_v54 }
 0x312   :  { %v310_v58 = vrot.slane %v309_v55, 1  ;;  %v443_v59 = vpop.permute.xlu1 %442  ;;  %v410_v22 = vmul.f32 %v408_v36, %v319_v3  ;;  %v386_v8 = vmul.f32 %v781_v61, %v319_v3  ;;  %v422_v54 = vmul.f32 %v420_v48, %v319_v3 }
 0x313   :  { %v304_v63 = vadd.f32 %v303_v57, %v302_v49  ;;  %v448_v0 = vpop.permute.xlu0 %447  ;;  %v445_v32 = vmul.f32 %v443_v59, %v319_v3 }
 0x314   :  { %v311_v9 = vadd.f32 %v310_v58, %v309_v55 }
 0x316   :  { %v328_v11 = vsel %vm134_vm1, %v311_v9, %v304_v63 }
 0x317   :  { %v466_v12 = vpop.permute.xlu1 %465  ;;  %v367_v16 = vmul.f32 %v365_v15, %v328_v11  ;;  %v391_v60 = vmul.f32 %v389_v5, %v328_v11  ;;  %v343_v19 = vmul.f32 %v771_v62, %v328_v11  ;;  %v330_v21 = vmul.f32 %v328_v11, %v777_v10 }
 0x318   :  { %v413_v18 = vpop.permute.xlu0 %412  ;;  %v427_v25 = vmul.f32 %v425_v46, %v328_v11  ;;  %v468_v62 = vmul.f32 %v466_v12, %v319_v3  ;;  %v450_v29 = vmul.f32 %v448_v0, %v328_v11 }
 0x319   :  { %v415_v23 = vmul.f32 %v413_v18, %v328_v11  ;;  %v368_v24 = vadd.f32 %v367_v16, %v362_v14  ;;  %v344_v1 = vadd.f32 %v343_v19, %v338_v17  ;;  %v331_v6 = vadd.f32 %v330_v21, %v321_v20 }
 0x31a   :  { %v392_v15 = vadd.f32 %v391_v60, %v386_v8  ;;  %v428_v61 = vadd.f32 %v427_v25, %v422_v54  ;;  %v451_v33 = vadd.f32 %v450_v29, %v445_v32 }
 0x31b   :  { %v416_v7 = vadd.f32 %v415_v23, %v410_v22  ;;  %v376_v56 = vrot.slane %v368_v24, %v351_v13  ;;  %v352_v26 = vrot.slane %v344_v1, %v351_v13  ;;  %333 = vst.msk [vmem:[#allocation3] sm:$0x3] %vm332_vm5, %v331_v6 }
 0x31c   :  { %v471_v27 = vpop.permute.xlu1 %470  ;;  %v400_v30 = vrot.slane %v392_v15, %v351_v13  ;;  %v436_v34 = vrot.slane %v428_v61, %v351_v13  ;;  %v459_v35 = vrot.slane %v451_v33, %v351_v13 }
 0x31d   :  { %v473_v28 = vmul.f32 %v471_v27, %v328_v11  ;;  %417 = vst.msk [vmem:[#allocation3 + $0x2] sm:$0x3] %vm332_vm5, %v416_v7  ;;  %377 = vrot.lane.b32.xlu1 %v376_v56, %s592_s0  ;;  %353 = vrot.lane.b32.xlu0 %v352_v26, %s593_s30 }
 0x31f   :  { %v474_v10 = vadd.f32 %v473_v28, %v468_v62 }
 0x321   :  { %v482_v31 = vrot.slane %v474_v10, %v351_v13  ;;  %401 = vrot.lane.b32.xlu1 %v400_v30, %s591_s27 }
 0x323   :  { %483 = vrot.lane.b32.xlu0 %v482_v31, %s591_s27 }
 0x325   :  { %437 = vrot.lane.b32.xlu1 %v436_v34, %s593_s30 }
 0x329   :  { %460 = vrot.lane.b32.xlu1 %v459_v35, %s592_s0 }
 0x38f   :  { %v354_v36 = vpop.permute.xlu0 %353  ;;  %v378_v37 = vpop.permute.xlu1 %377 }
 0x390   :  { %357 = vst.msk [vmem:[#allocation3] sm:$0x3] %vm356_vm6, %v354_v36 }
 0x391   :  { %381 = vst.msk [vmem:[#allocation3] sm:$0x3] %vm380_vm7, %v378_v37 }
 0x393   :  { %v402_v4 = vpop.permute.xlu1 %401 }
 0x394   :  { %405 = vst.msk [vmem:[#allocation3] sm:$0x3] %vm404_vm8, %v402_v4 }
 0x395   :  { %v484_v39 = vpop.permute.xlu0 %483 }
 0x397   :  { %v438_v38 = vpop.permute.xlu1 %437 }
 0x398   :  { %440 = vst.msk [vmem:[#allocation3 + $0x2] sm:$0x3] %vm356_vm6, %v438_v38 }
 0x39b   :  { %v461_v5 = vpop.permute.xlu1 %460 }
 0x39c   :  { %463 = vst.msk [vmem:[#allocation3 + $0x2] sm:$0x3] %vm380_vm7, %v461_v5 }
 0x39d   :  { %486 = vst.msk [vmem:[#allocation3 + $0x2] sm:$0x3] %vm404_vm8, %v484_v39 }
 0x39e   :  { %579 = shalt.err (!%p576_p4)
}
 0x39f   :  { %496 = dma.vmem_to_hbm [thread:$0]  %s494_s7, 64, %s809_s4, [#allocation4]  }
 0x3a0   :  { %588 = dma.done.wait [#allocation4], 64  }
 0x3a1   :  { %589 = vsyncadd [#allocation4], 4294967232 }
 0x3a2   :  { %500 = vsyncpa [#allocation4], 1 }

</bundles_post_ra>
